<compile_context>
chip_gen: v5e
topology: v5e:2x2
jax: 0.10.0
libtpu: 0.0.40
codegen_flags: <defaults>
</compile_context>

<pallas_src>
import math
from functools import partial

import jax
import jax.numpy as jnp
from jax.experimental import pallas as pl
from jax.experimental.pallas import tpu as pltpu


def _round_up(a, b):
    return -(-a // b) * b


def _vmem_capacity_bytes():
    try:
        info = pltpu.get_tpu_info()
        cap = int(getattr(info, "vmem_capacity_bytes", 0) or 0)
        if cap > 0:
            return cap
    except Exception:
        pass
    return 64 * 1024 * 1024  # conservative default: v7x per-TC VMEM


def _default_block_bytes(vmem_cap):
    # Memory-bound kernel: large blocks amortize the ~0.35us per-step overhead
    # while leaving room for double-buffering + output staging + headroom.
    return max(2 << 20, min(12 << 20, vmem_cap // 8))


# ----------------------------- kernels --------------------------------------


def _mean_roll_kernel(x_ref, o_ref, *, r, n_post, inv_r):
    """Lane-dense path: x_ref is (tp, r*n_post); reduce the r contiguous
    segments of each row with log2(r) cyclic roll-adds on the lane axis
    (direction is irrelevant because the roll is cyclic over exactly r*n_post)."""
    x = x_ref[...].astype(jnp.float32)
    step = n_post
    while step < r * n_post:
        x = x + pltpu.roll(x, shift=step, axis=1)
        step *= 2
    o_ref[...] = (x[:, :n_post] * jnp.float32(inv_r)).astype(o_ref.dtype)


def _mean_1step_kernel(x_ref, o_ref, *, inv_r):
    """General path, whole reduction axis in one block: no scratch needed."""
    xf = x_ref[...].astype(jnp.float32)
    o_ref[...] = (jnp.sum(xf, axis=1) * jnp.float32(inv_r)).astype(o_ref.dtype)


def _mean_acc_kernel(x_ref, o_ref, acc_ref, *, r_total, inv_r, mask_r):
    """General path, tiled reduction axis with resident f32 accumulator."""
    k = pl.program_id(2)
    last = pl.num_programs(2) - 1

    @pl.when(k == 0)
    def _init():
        acc_ref[...] = jnp.zeros_like(acc_ref)

    if mask_r:
        tr = x_ref.shape[1]

        @pl.when(k < last)
        def _full():
            acc_ref[...] += jnp.sum(x_ref[...].astype(jnp.float32), axis=1)

        @pl.when(k == last)
        def _ragged():
            row = jax.lax.broadcasted_iota(jnp.int32, (1, tr, 1), 1)
            xf = jnp.where(row < (r_total - k * tr),
                           x_ref[...].astype(jnp.float32), 0.0)
            acc_ref[...] += jnp.sum(xf, axis=1)
    else:
        acc_ref[...] += jnp.sum(x_ref[...].astype(jnp.float32), axis=1)

    @pl.when(k == last)
    def _done():
        o_ref[...] = (acc_ref[...] * jnp.float32(inv_r)).astype(o_ref.dtype)


# ----------------------------- wrapper ---------------------------------------


def _fix_pre_tile(tp, n_pre):
    """Output blocks are 2-D (tp, tl): tp must be a multiple of 8 or == n_pre."""
    tp = min(tp, n_pre)
    if tp < n_pre:
        tp = max(8, (tp // 8) * 8)
        tp = min(tp, n_pre)
    return tp


def _pool_mean_pallas(x, dim, *, target_block_bytes=None):
    """jnp equivalent of torch.mean(x, dim) with the reduction done in Pallas."""
    ndim = x.ndim
    dim = dim % ndim
    shape = x.shape
    n_pre = math.prod(shape[:dim]) if dim > 0 else 1
    r = shape[dim]
    n_post = math.prod(shape[dim + 1:]) if dim < ndim - 1 else 1
    out_shape = shape[:dim] + shape[dim + 1:]

    if r == 1:
        return x.reshape(out_shape)

    itemsize = jnp.dtype(x.dtype).itemsize
    vmem_cap = _vmem_capacity_bytes()
    if target_block_bytes is None:
        target_block_bytes = _default_block_bytes(vmem_cap)

    total_bytes = n_pre * r * n_post * itemsize
    sub = 8 * max(1, 4 // itemsize)          # dtype-native sublane multiple
    vmem_cap_limit = int(vmem_cap * 0.75)

    # ---------------- fast lane-dense path (small n_post, pow-2 r) ----------
    L = r * n_post
    L_pad = _round_up(L, 128)
    use_roll = (
        n_post < 128
        and r >= 2
        and (r & (r - 1)) == 0               # power-of-2 reduction
        and L % 128 == 0                     # clean lane-dense rows
        and L_pad * itemsize * 8 <= target_block_bytes
    )

    if use_roll:
        x2 = x.reshape(n_pre, L)
        tp = max(1, target_block_bytes // (L_pad * itemsize))
        tp = min(tp, n_pre)
        # Give both v7x TensorCores work when the problem is big enough.
        if tp >= n_pre and n_pre >= 2 and total_bytes > (1 << 20):
            tp = pl.cdiv(n_pre, 2)
        tp = _fix_pre_tile(tp, n_pre)

        in_block = _round_up(tp, 8) * L_pad * itemsize
        out_block = _round_up(tp, 8) * _round_up(n_post, 128) * itemsize
        vmem_limit = min(max(2 * in_block + 2 * out_block + (8 << 20), 32 << 20),
                         vmem_cap_limit)

        cost = pl.CostEstimate(
            flops=n_pre * L,
            transcendentals=0,
            bytes_accessed=(n_pre * L + n_pre * n_post) * itemsize,
        )
        out2 = pl.pallas_call(
            partial(_mean_roll_kernel, r=r, n_post=n_post, inv_r=1.0 / r),
            out_shape=jax.ShapeDtypeStruct((n_pre, n_post), x.dtype),
            grid_spec=pltpu.PrefetchScalarGridSpec(
                num_scalar_prefetch=0,
                grid=(pl.cdiv(n_pre, tp),),
                in_specs=[pl.BlockSpec((tp, L), lambda i: (i, 0))],
                out_specs=pl.BlockSpec((tp, n_post), lambda i: (i, 0)),
            ),
            compiler_params=pltpu.CompilerParams(
                dimension_semantics=("parallel",),
                vmem_limit_bytes=vmem_limit),
            cost_estimate=cost,
        )(x2)
        return out2.reshape(out_shape)

    # ---------------- general 3-D path (n_pre, r, n_post) -------------------
    x3 = x.reshape(n_pre, r, n_post)

    # Lane tile: multiples of 128 when possible, else the (small) full post dim.
    if n_post >= 128:
        tl = min(2048, (n_post // 128) * 128)
        tl_pad = tl
    else:
        tl = n_post
        tl_pad = 128

    budget = max(1, target_block_bytes // itemsize)   # elements, padding-aware below
    r_pad = _round_up(r, sub)
    if r <= sub or r_pad * tl_pad * 8 <= budget:
        tr = r                                         # full dim -> always legal
        tr_pad = r_pad
    else:
        tr = max(sub, ((budget // (8 * tl_pad)) // sub) * sub)
        tr = min(tr, r)
        tr_pad = _round_up(tr, sub)

    tp = max(1, budget // (tr_pad * tl_pad))
    tp = min(tp, n_pre)
    lane_blocks = pl.cdiv(n_post, tl)
    if tp >= n_pre and lane_blocks == 1 and n_pre >= 2 and total_bytes > (1 << 20):
        tp = pl.cdiv(n_pre, 2)                         # keep both v7x TCs busy
    tp = _fix_pre_tile(tp, n_pre)

    n_r_blocks = pl.cdiv(r, tr)
    grid = (pl.cdiv(n_pre, tp), lane_blocks, n_r_blocks)

    in_block_bytes = tp * tr_pad * tl_pad * itemsize
    out_block_bytes = _round_up(tp, 8) * tl_pad * itemsize
    acc_bytes = _round_up(tp, 8) * tl_pad * 4
    vmem_limit = min(
        max(2 * in_block_bytes + 2 * out_block_bytes + acc_bytes + (8 << 20),
            32 << 20),
        vmem_cap_limit)

    if n_r_blocks == 1:
        kernel = partial(_mean_1step_kernel, inv_r=1.0 / r)
        scratch = []
    else:
        kernel = partial(_mean_acc_kernel, r_total=r, inv_r=1.0 / r,
                         mask_r=(r % tr != 0))
        scratch = [pltpu.VMEM((tp, tl), jnp.float32)]

    cost = pl.CostEstimate(
        flops=n_pre * r * n_post + n_pre * n_post,
        transcendentals=0,
        bytes_accessed=(n_pre * r * n_post + n_pre * n_post) * itemsize,
    )

    out2 = pl.pallas_call(
        kernel,
        out_shape=jax.ShapeDtypeStruct((n_pre, n_post), x.dtype),
        grid_spec=pltpu.PrefetchScalarGridSpec(
            num_scalar_prefetch=0,
            grid=grid,
            in_specs=[pl.BlockSpec((tp, tr, tl), lambda i, j, k: (i, k, j))],
            out_specs=pl.BlockSpec((tp, tl), lambda i, j, k: (i, j)),
            scratch_shapes=scratch,
        ),
        compiler_params=pltpu.CompilerParams(
            dimension_semantics=("parallel", "parallel", "arbitrary"),
            vmem_limit_bytes=vmem_limit),
        cost_estimate=cost,
    )(x3)
    return out2.reshape(out_shape)


class CollapseDim:
    """JAX/Pallas port of the PyTorch CollapseDim module."""

    def __init__(self, dim, mode="pool", pool_fn=None, combine_dim=None):
        self.dim = dim
        self.mode = mode
        self.pool_fn = pool_fn          # None -> default torch.mean behaviour
        self.combine_dim = combine_dim

    def __call__(self, x):
        if self.mode == "pool":
            if self.pool_fn is None:
                return _pool_mean_pallas(x, self.dim)
            # TODO(synk): only the default pool_fn (mean) is lowered to Pallas;
            # custom pool_fns run as plain JAX callables.
            return self.pool_fn(x, self.dim)
        elif self.mode == "combine":
            # Faithful to the PyTorch code: multiplies/divides by the axis
            # *index* `dim` (not the axis size), then .view(s).
            s = list(x.shape)
            s[self.combine_dim] *= self.dim
            s[self.dim] //= self.dim
            return x.reshape(s)
        else:
            raise ValueError(f"unknown mode {self.mode}")


if __name__ == "__main__":
    key = jax.random.PRNGKey(0)

    # ESC50 MobileNet usage: CollapseDim(dim=2) pools away the frequency axis (NCHW).
    x = jax.random.normal(key, (2, 4, 16, 16), dtype=jnp.float32)
    module = CollapseDim(dim=2, mode="pool")
    y = jax.block_until_ready(module(x))
    y_ref = jnp.mean(x, axis=2)
    assert y.shape == y_ref.shape, (y.shape, y_ref.shape)
    assert jnp.allclose(y, y_ref, atol=1e-5, rtol=1e-5), "mismatch (roll fast path)"

    # bf16 activations (typical MobileNet) through the fast path, f32 accumulation.
    xb = x.astype(jnp.bfloat16)
    yb = jax.block_until_ready(module(xb))
    yb_ref = jnp.mean(xb.astype(jnp.float32), axis=2).astype(jnp.bfloat16)
    assert jnp.allclose(yb.astype(jnp.float32), yb_ref.astype(jnp.float32),
                        atol=2e-2, rtol=2e-2), "mismatch (bf16 fast path)"

    # Lane-tiled general path (n_post >= 128, ragged lane block, single r step).
    x2 = jax.random.normal(jax.random.PRNGKey(1), (2, 4, 20, 130), dtype=jnp.float32)
    y2 = jax.block_until_ready(_pool_mean_pallas(x2, 2))
    assert jnp.allclose(y2, jnp.mean(x2, axis=2), atol=1e-5, rtol=1e-5), \
        "mismatch (lane-tiled path)"

    # Force reduction-axis tiling + masking with a tiny block budget.
    y3 = jax.block_until_ready(_pool_mean_pallas(x2, 2, target_block_bytes=4096))
    assert jnp.allclose(y3, jnp.mean(x2, axis=2), atol=1e-5, rtol=1e-5), \
        "mismatch (tiled/masked reduction)"

    # Non-power-of-2 r with small n_post -> general path fallback.
    x4 = jax.random.normal(jax.random.PRNGKey(2), (2, 4, 10, 16), dtype=jnp.float32)
    y4 = jax.block_until_ready(_pool_mean_pallas(x4, 2))
    assert jnp.allclose(y4, jnp.mean(x4, axis=2), atol=1e-5, rtol=1e-5), \
        "mismatch (non-pow2 fallback)"

    # 'combine' mode: pure reshape glue, mirroring the torch .view arithmetic.
    mod_c = CollapseDim(dim=2, mode="combine", combine_dim=1)
    y_c = jax.block_until_ready(mod_c(x))
    assert y_c.shape == (2, 4 * 2, 16 // 2, 16)

    print("KERNEL_OK")
</pallas_src>

<mosaic_0001>
module attributes {stable_mosaic.version = 11 : i64} {
  func.func @_mean_roll_kernel(%arg0: i32, %arg1: memref<8x256xf32, #tpu.memory_space<vmem>>, %arg2: memref<8x16xf32, #tpu.memory_space<vmem>>) attributes {dimension_semantics = [#tpu.dimension_semantics<parallel>], iteration_bounds = array<i64: 1>, scalar_prefetch = 0 : i64, scratch_operands = 0 : i64, tpu.core_type = #tpu.core_type<tc>, window_params = [{transform_indices = @transform_0, window_bounds = array<i64: 8, 256>}, {transform_indices = @transform_1, window_bounds = array<i64: 8, 16>}]} {
    %c0 = arith.constant 0 : index
    %c0_0 = arith.constant 0 : index
    %0 = vector.load %arg1[%c0, %c0_0] : memref<8x256xf32, #tpu.memory_space<vmem>>, vector<8x256xf32>
    %c16_i32 = arith.constant 16 : i32
    %1 = tpu.dynamic_rotate %0 by %c16_i32 dim 1 : vector<8x256xf32>, i32 -> vector<8x256xf32>
    %2 = arith.addf %0, %1 : vector<8x256xf32>
    %c32_i32 = arith.constant 32 : i32
    %3 = tpu.dynamic_rotate %2 by %c32_i32 dim 1 : vector<8x256xf32>, i32 -> vector<8x256xf32>
    %4 = arith.addf %2, %3 : vector<8x256xf32>
    %c64_i32 = arith.constant 64 : i32
    %5 = tpu.dynamic_rotate %4 by %c64_i32 dim 1 : vector<8x256xf32>, i32 -> vector<8x256xf32>
    %6 = arith.addf %4, %5 : vector<8x256xf32>
    %c128_i32 = arith.constant 128 : i32
    %7 = tpu.dynamic_rotate %6 by %c128_i32 dim 1 : vector<8x256xf32>, i32 -> vector<8x256xf32>
    %8 = arith.addf %6, %7 : vector<8x256xf32>
    %9 = vector.extract_strided_slice %8 {offsets = [0, 0], sizes = [8, 16], strides = [1, 1]} : vector<8x256xf32> to vector<8x16xf32>
    %cst = arith.constant 6.250000e-02 : f32
    %10 = vector.broadcast %cst : f32 to vector<8x16xf32>
    %11 = arith.mulf %9, %10 : vector<8x16xf32>
    %c0_1 = arith.constant 0 : index
    %c0_2 = arith.constant 0 : index
    %12 = vector.load %arg2[%c0_1, %c0_2] : memref<8x16xf32, #tpu.memory_space<vmem>>, vector<8x16xf32>
    tpu.vector_store %arg2[%c0_1, %c0_2], %11 {strides = array<i32>} : memref<8x16xf32, #tpu.memory_space<vmem>>, vector<8x16xf32>,
    return
  }
  func.func @transform_0(%arg0: i32) -> (i32, i32) {
    %c0_i32 = arith.constant 0 : i32
    %c0_i32_0 = arith.constant 0 : i32
    return %arg0, %c0_i32 : i32, i32
  }
  func.func @transform_1(%arg0: i32) -> (i32, i32) {
    %c0_i32 = arith.constant 0 : i32
    %c0_i32_0 = arith.constant 0 : i32
    return %arg0, %c0_i32 : i32, i32
  }
}

</mosaic_0001>

<bundles_post_ra>
// kernel: tpu_custom_call.1
= control target key start
LH: loop header
LB: loop body
LE: loop exit
PB: predicated region body
PF: predicated region fallthrough
CT: control target
= control target key end

     0   :  { %6 = vsyncpa [#allocation3], 0  ;;  %s153_s0 = inlined_call_operand.hbm [shape: f32[8,256], index: 0, kind: input, shape index: {}]   ;;  %s154_s1 = inlined_call_operand.hbm [shape: f32[8,16], index: 1, kind: output, shape index: {}]  }
   0x1   :  { %7 = vsyncpa [#allocation4], 0  ;;  %s13_s8 = sshll.u32 %s153_s0, 4  ;;  %s132_s9 = smov [#allocation2]   ;;  %s14_s8 = int_to_ptr.hbm [resolvable:$true] %s13_s8 }
   0x2   :  { %s15_s10 = sshll.u32 %s132_s9, 4  ;;  %s16_s10 = int_to_ptr.vmem [resolvable:$true] %s15_s10 }
   0x3   :  { %18 = dma.hbm_to_vmem [thread:$0]  %s14_s8, 256, %s16_s10, [#allocation3]  }
   0x4   :  { %128 = dma.done.wait [#allocation3], 256  }
   0x5   :  { %129 = vsyncadd [#allocation3], 4294967040  ;;  %v23_v0 = vld [vmem:[#allocation2] sm:$0xff]  ;;  %s133_s11 = smov 16   ;;  %v24_v1 = vld [vmem:[#allocation2 + $0x8] sm:$0xff]  ;;  %v29_v2 = vlaneseq  ;;  %s134_s0 = smov 32  }
   0x6   :  { %25 = vrot.lane.b32.xlu0 %v23_v0, %s133_s11  ;;  %s135_s12 = smov 64   ;;  %s136_s13 = smov [#allocation5]   ;;  %vm56_vm3 = vcmask 130048  }
   0x7   :  { %v30_v4 = vand.u32 127, %v29_v2  ;;  %s63_s14 = sshll.u32 %s136_s13, 4  ;;  %s65_s17 = sshll.u32 %s154_s1, 4  ;;  %s64_s14 = int_to_ptr.vmem [resolvable:$true] %s63_s14  ;;  %s66_s17 = int_to_ptr.hbm [resolvable:$true] %s65_s17 }
   0x9   :  { %vm31_vm0 = vcmp.lt.s32.totalorder %v30_v4, 16  ;;  %vm40_vm1 = vcmp.lt.s32.totalorder %v30_v4, 32  ;;  %vm49_vm2 = vcmp.lt.s32.totalorder %v30_v4, 64 }
   0xe   :  { %27 = vrot.lane.b32.xlu0 %v24_v1, %s133_s11 }
  0x78   :  { %v26_v3 = vpop.permute.xlu0 %25 }
  0x80   :  { %v28_v5 = vpop.permute.xlu0 %27 }
  0x81   :  { %v33_v6 = vsel %vm31_vm0, %v28_v5, %v26_v3  ;;  %v32_v8 = vsel %vm31_vm0, %v26_v3, %v28_v5 }
  0x82   :  { %v34_v7 = vadd.f32 %v33_v6, %v23_v0  ;;  %v35_v9 = vadd.f32 %v32_v8, %v24_v1 }
  0x84   :  { %36 = vrot.lane.b32.xlu1 %v34_v7, %s134_s0 }
  0x8c   :  { %38 = vrot.lane.b32.xlu1 %v35_v9, %s134_s0 }
  0xf6   :  { %v37_v10 = vpop.permute.xlu1 %36 }
  0xfe   :  { %v39_v11 = vpop.permute.xlu1 %38 }
  0xff   :  { %v42_v12 = vsel %vm40_vm1, %v39_v11, %v37_v10  ;;  %v41_v14 = vsel %vm40_vm1, %v37_v10, %v39_v11 }
 0x100   :  { %v43_v13 = vadd.f32 %v42_v12, %v34_v7  ;;  %v44_v15 = vadd.f32 %v41_v14, %v35_v9 }
 0x102   :  { %45 = vrot.lane.b32.xlu2 %v43_v13, %s135_s12 }
 0x10a   :  { %47 = vrot.lane.b32.xlu2 %v44_v15, %s135_s12 }
 0x15c   :  { %v46_v16 = vpop.permute.xlu2 %45 }
 0x164   :  { %v48_v17 = vpop.permute.xlu2 %47 }
 0x165   :  { %v50_v18 = vsel %vm49_vm2, %v46_v16, %v48_v17  ;;  %v51_v19 = vsel %vm49_vm2, %v48_v17, %v46_v16 }
 0x166   :  { %v52_v20 = vadd.f32 %v51_v19, %v43_v13  ;;  %v53_v21 = vadd.f32 %v50_v18, %v44_v15 }
 0x168   :  { %v54_v22 = vadd.f32 %v53_v21, %v52_v20 }
 0x16a   :  { %v55_v23 = vmul.f32 0.0625, %v54_v22 }
 0x16c   :  { %57 = vst.msk [vmem:[#allocation5] sm:$0xff] %vm56_vm3, %v55_v23 }
 0x16d   :  { %68 = dma.vmem_to_hbm [thread:$0]  %s64_s14, 128, %s66_s17, [#allocation4]  }
 0x16e   :  { %130 = dma.done.wait [#allocation4], 128  }
 0x16f   :  { %131 = vsyncadd [#allocation4], 4294967168 }
 0x170   :  { %73 = vsyncpa [#allocation3], 1 }
 0x171   :  { %74 = vsyncpa [#allocation4], 1 }

</bundles_post_ra>
